<compile_context>
chip_gen: v6e
topology: v6e:2x2x1
jax: 0.10.0
libtpu: 0.0.40
codegen_flags: <defaults>
</compile_context>

<pallas_src>
import functools

import jax
import jax.numpy as jnp
from jax import lax
from jax.experimental import pallas as pl
from jax.experimental.pallas import tpu as pltpu


def _choose_tile(n, candidates=(1024, 512, 256, 128, 64, 32, 16, 8)):
    """Largest tile (multiple of 8) that divides n; fall back to full n."""
    for t in candidates:
        if n % t == 0:
            return t
    return n


def _choose_head_block(num_heads, head_dim, max_cols=512):
    """Heads processed per attention grid step (lane-dense output tiles)."""
    if num_heads * head_dim <= max_cols:
        return num_heads                       # full head dim -> always legal
    best = 1
    for h in range(8, num_heads + 1, 8):       # sublane-legal block sizes
        if num_heads % h == 0 and h * head_dim <= max_cols:
            best = h
    return best


# --------------------------------------------------------------------------
# Kernel 1: fused QKV projection   (M, D) x (D, 3D) -> (M, 3D),  M = B*N
# --------------------------------------------------------------------------
def _qkv_proj_kernel(x_ref, wqkv_ref, o_ref):
    o_ref[...] = jnp.dot(
        x_ref[...], wqkv_ref[...], preferred_element_type=jnp.float32
    ).astype(o_ref.dtype)


def _qkv_proj(x2d, wqkv, *, tm):
    M, D = x2d.shape
    D3 = wqkv.shape[1]
    return pl.pallas_call(
        _qkv_proj_kernel,
        out_shape=jax.ShapeDtypeStruct((M, D3), x2d.dtype),
        grid_spec=pltpu.PrefetchScalarGridSpec(
            num_scalar_prefetch=0,
            grid=(M // tm,),
            in_specs=[
                pl.BlockSpec((tm, D), lambda i: (i, 0)),     # x rows tile
                pl.BlockSpec((D, D3), lambda i: (0, 0)),     # fused Wqkv (invariant)
            ],
            out_specs=pl.BlockSpec((tm, D3), lambda i: (i, 0)),
        ),
        compiler_params=pltpu.CompilerParams(dimension_semantics=("parallel",)),
    )(x2d, wqkv)


# --------------------------------------------------------------------------
# Kernel 2: multi-head attention, flash-style online softmax.
#   qkv: (B, N, 3, H, hd)  (passed three times, index_map picks q/k/v + head block)
#   out: (B, N, D)         (lane-dense (tq, Hblk*hd) tiles, heads contiguous)
# --------------------------------------------------------------------------
def _mha_kernel(q_ref, k_ref, v_ref, o_ref, m_sc, l_sc, acc_sc, *, hblk, hd):
    ki = pl.program_id(3)

    @pl.when(ki == 0)
    def _():
        m_sc[...] = jnp.full(m_sc.shape, -jnp.inf, dtype=m_sc.dtype)
        l_sc[...] = jnp.zeros(l_sc.shape, dtype=l_sc.dtype)
        acc_sc[...] = jnp.zeros(acc_sc.shape, dtype=acc_sc.dtype)

    # Short static loop over the heads of this head block (unrolled at trace).
    for h in range(hblk):
        qh = q_ref[0, :, 0, h, :]                       # (tq, hd), input dtype
        kh = k_ref[0, :, 0, h, :]                       # (tk, hd)
        vh = v_ref[0, :, 0, h, :]                       # (tk, hd)

        # scores = q @ k^T (contract head_dim, no explicit transpose).
        # Softmax scale is already folded into Wq -> q.
        s = lax.dot_general(qh, kh, (((1,), (1,)), ((), ())),
                            preferred_element_type=jnp.float32)   # (tq, tk) f32

        m_prev = m_sc[h]                                # (tq, 1)
        m_new = jnp.maximum(m_prev, jnp.max(s, axis=-1, keepdims=True))
        alpha = jnp.exp(m_prev - m_new)                 # (tq, 1)
        p = jnp.exp(s - m_new)                          # (tq, tk) f32

        l_sc[h] = alpha * l_sc[h] + jnp.sum(p, axis=-1, keepdims=True)
        # Deferred normalization: accumulate un-normalized p @ v.
        acc_sc[h] = alpha * acc_sc[h] + jnp.dot(
            p.astype(vh.dtype), vh, preferred_element_type=jnp.float32)
        m_sc[h] = m_new

    @pl.when(ki == pl.num_programs(3) - 1)
    def _():
        for h in range(hblk):
            out_h = acc_sc[h] / l_sc[h]                 # (tq, hd), exact division
            o_ref[0, :, h * hd:(h + 1) * hd] = out_h.astype(o_ref.dtype)


def _mha(qkv, *, B, N, D, H, hd, tq, tk, hblk):
    kernel = functools.partial(_mha_kernel, hblk=hblk, hd=hd)
    return pl.pallas_call(
        kernel,
        out_shape=jax.ShapeDtypeStruct((B, N, D), qkv.dtype),
        grid_spec=pltpu.PrefetchScalarGridSpec(
            num_scalar_prefetch=0,
            grid=(B, H // hblk, N // tq, N // tk),
            in_specs=[
                # q tile: qkv index 0, head block hb, q-row tile qi
                pl.BlockSpec((1, tq, 1, hblk, hd),
                             lambda b, hb, qi, ki: (b, qi, 0, hb, 0)),
                # k tile: qkv index 1, kv-row tile ki
                pl.BlockSpec((1, tk, 1, hblk, hd),
                             lambda b, hb, qi, ki: (b, ki, 1, hb, 0)),
                # v tile: qkv index 2, kv-row tile ki
                pl.BlockSpec((1, tk, 1, hblk, hd),
                             lambda b, hb, qi, ki: (b, ki, 2, hb, 0)),
            ],
            # Output block constant across ki -> accumulator-resident;
            # heads are contiguous columns of (B, N, D) so writeback is lane-dense.
            out_specs=pl.BlockSpec((1, tq, hblk * hd),
                                   lambda b, hb, qi, ki: (b, qi, hb)),
            scratch_shapes=[
                pltpu.VMEM((hblk, tq, 1), jnp.float32),   # running max m
                pltpu.VMEM((hblk, tq, 1), jnp.float32),   # running sum l
                pltpu.VMEM((hblk, tq, hd), jnp.float32),  # un-normalized acc
            ],
        ),
        compiler_params=pltpu.CompilerParams(
            dimension_semantics=("parallel", "parallel", "parallel", "arbitrary")),
    )(qkv, qkv, qkv)


# --------------------------------------------------------------------------
# Kernel 3: output projection   (M, D) x (D, D) + (1, D) -> (M, D)
# --------------------------------------------------------------------------
def _out_proj_kernel(y_ref, wp_ref, bp_ref, o_ref):
    acc = jnp.dot(y_ref[...], wp_ref[...], preferred_element_type=jnp.float32)
    o_ref[...] = (acc + bp_ref[...].astype(jnp.float32)).astype(o_ref.dtype)


def _out_proj(y2d, wp, bp, *, tm):
    M, D = y2d.shape
    return pl.pallas_call(
        _out_proj_kernel,
        out_shape=jax.ShapeDtypeStruct((M, D), y2d.dtype),
        grid_spec=pltpu.PrefetchScalarGridSpec(
            num_scalar_prefetch=0,
            grid=(M // tm,),
            in_specs=[
                pl.BlockSpec((tm, D), lambda i: (i, 0)),   # y rows tile
                pl.BlockSpec((D, D), lambda i: (0, 0)),    # Wproj (invariant)
                pl.BlockSpec((1, D), lambda i: (0, 0)),    # bproj
            ],
            out_specs=pl.BlockSpec((tm, D), lambda i: (i, 0)),
        ),
        compiler_params=pltpu.CompilerParams(dimension_semantics=("parallel",)),
    )(y2d, wp, bp)


# --------------------------------------------------------------------------
# Parameter fusion (done ONCE, not per forward): fold the softmax scale into
# Wq and fuse Q/K/V weights into a single (D, 3D) matrix.
# --------------------------------------------------------------------------
def fuse_attention_params(wq, wk, wv, wp, bp, *, num_heads, qk_scale=None,
                          dtype=None):
    D = wq.shape[0]
    hd = D // num_heads
    scale = qk_scale if qk_scale is not None else hd ** (-0.5)
    dtype = dtype if dtype is not None else wq.dtype
    wqkv = jnp.concatenate([wq * scale, wk, wv], axis=1).astype(dtype)
    return wqkv, wp.astype(dtype), bp.astype(dtype)


# --------------------------------------------------------------------------
# Full forward (matches Attention.forward with context=None, mask=None,
# attn_drop = proj_drop = identity at p=0.0).
# --------------------------------------------------------------------------
def attention_pallas(x, wqkv, wp, bp, *, num_heads):
    B, N, D = x.shape
    hd = D // num_heads
    M = B * N

    tm = _choose_tile(M)
    tq = _choose_tile(N)
    tk = _choose_tile(N)
    hblk = _choose_head_block(num_heads, hd)

    # Fused QKV projection over flattened rows; no transposes anywhere below,
    # only free (contiguous) reshapes.
    qkv = _qkv_proj(x.reshape(M, D), wqkv, tm=tm)        # (M, 3D)
    qkv = qkv.reshape(B, N, 3, num_heads, hd)            # free reshape

    o = _mha(qkv, B=B, N=N, D=D, H=num_heads, hd=hd,
             tq=tq, tk=tk, hblk=hblk)                    # (B, N, D), heads merged

    out = _out_proj(o.reshape(M, D), wp, bp, tm=tm)      # (M, D)
    return out.reshape(B, N, D)


def attention_reference(x, wq, wk, wv, wp, bp, *, num_heads):
    """Plain-JAX reference mirroring the PyTorch forward."""
    B, N, D = x.shape
    hd = D // num_heads
    scale = hd ** (-0.5)
    q = x @ wq
    k = x @ wk
    v = x @ wv

    def split(t):  # b n (h d) -> b h n d
        return t.reshape(B, N, num_heads, hd).transpose(0, 2, 1, 3)

    q, k, v = split(q), split(k), split(v)
    dots = jnp.einsum('bhid,bhjd->bhij', q, k) * scale
    attn = jax.nn.softmax(dots, axis=-1)
    out = jnp.einsum('bhij,bhjd->bhid', attn, v)
    out = out.transpose(0, 2, 1, 3).reshape(B, N, D)
    return out @ wp + bp


if __name__ == "__main__":
    # Small deterministic shapes consistent with the module.
    B, N, D = 2, 8, 32
    num_heads = 4

    key = jax.random.PRNGKey(0)
    kx, kq, kk, kv, kp, kb = jax.random.split(key, 6)

    x = jax.random.normal(kx, (B, N, D), dtype=jnp.float32)
    # qkv_bias=False -> no q/k/v bias; proj has bias.
    wq = jax.random.normal(kq, (D, D), dtype=jnp.float32) * 0.05
    wk = jax.random.normal(kk, (D, D), dtype=jnp.float32) * 0.05
    wv = jax.random.normal(kv, (D, D), dtype=jnp.float32) * 0.05
    wp = jax.random.normal(kp, (D, D), dtype=jnp.float32) * 0.05
    bp = jax.random.normal(kb, (1, D), dtype=jnp.float32) * 0.05

    # Fused params built once (hoisted out of the per-call path).
    wqkv, wp_f, bp_f = fuse_attention_params(
        wq, wk, wv, wp, bp, num_heads=num_heads, dtype=x.dtype)

    out = attention_pallas(x, wqkv, wp_f, bp_f, num_heads=num_heads)
    out = jax.block_until_ready(out)

    ref = attention_reference(x, wq, wk, wv, wp, bp, num_heads=num_heads)
    assert out.shape == (B, N, D)
    # Scale folded into Wq + MXU accumulation-order differences -> small
    # deviations vs the XLA reference.
    assert jnp.allclose(out, ref, atol=2e-3, rtol=2e-3), "mismatch vs reference"

    # attn_drop / proj_drop are identity (p=0.0); mask/context default to None.
    print("KERNEL_OK")
</pallas_src>

<mosaic_0001>
module attributes {stable_mosaic.version = 11 : i64} {
  func.func @_qkv_proj_kernel(%arg0: i32, %arg1: memref<16x32xf32, #tpu.memory_space<vmem>>, %arg2: memref<32x96xf32, #tpu.memory_space<vmem>>, %arg3: memref<16x96xf32, #tpu.memory_space<vmem>>) attributes {dimension_semantics = [#tpu.dimension_semantics<parallel>], iteration_bounds = array<i64: 1>, scalar_prefetch = 0 : i64, scratch_operands = 0 : i64, tpu.core_type = #tpu.core_type<tc>, window_params = [{transform_indices = @transform_0, window_bounds = array<i64: 16, 32>}, {pipeline_mode = #tpu.pipeline_mode<synchronous>, transform_indices = @transform_1, window_bounds = array<i64: 32, 96>}, {transform_indices = @transform_2, window_bounds = array<i64: 16, 96>}]} {
    %c0 = arith.constant 0 : index
    %c0_0 = arith.constant 0 : index
    %0 = vector.load %arg1[%c0, %c0_0] : memref<16x32xf32, #tpu.memory_space<vmem>>, vector<16x32xf32>
    %c0_1 = arith.constant 0 : index
    %c0_2 = arith.constant 0 : index
    %1 = vector.load %arg2[%c0_1, %c0_2] : memref<32x96xf32, #tpu.memory_space<vmem>>, vector<32x96xf32>
    %cst = arith.constant dense<0.000000e+00> : vector<16x96xf32>
    %2 = tpu.matmul %0, %1, %cst {dimension_numbers = #tpu.dot_dimension_numbers<[1], [0], [0], [1], [0, 0, 1, 1], [], []>} : vector<16x32xf32>, vector<32x96xf32>, vector<16x96xf32> -> vector<16x96xf32>
    %c0_3 = arith.constant 0 : index
    %c0_4 = arith.constant 0 : index
    %3 = vector.load %arg3[%c0_3, %c0_4] : memref<16x96xf32, #tpu.memory_space<vmem>>, vector<16x96xf32>
    tpu.vector_store %arg3[%c0_3, %c0_4], %2 {strides = array<i32>} : memref<16x96xf32, #tpu.memory_space<vmem>>, vector<16x96xf32>,
    return
  }
  func.func @transform_0(%arg0: i32) -> (i32, i32) {
    %c0_i32 = arith.constant 0 : i32
    %c0_i32_0 = arith.constant 0 : i32
    return %arg0, %c0_i32 : i32, i32
  }
  func.func @transform_1(%arg0: i32) -> (i32, i32) {
    %c0_i32 = arith.constant 0 : i32
    %c0_i32_0 = arith.constant 0 : i32
    %c0_i32_1 = arith.constant 0 : i32
    return %c0_i32, %c0_i32_0 : i32, i32
  }
  func.func @transform_2(%arg0: i32) -> (i32, i32) {
    %c0_i32 = arith.constant 0 : i32
    %c0_i32_0 = arith.constant 0 : i32
    return %arg0, %c0_i32 : i32, i32
  }
}

</mosaic_0001>

<bundles_post_ra>
// kernel: tpu_custom_call.1
= control target key start
LH: loop header
LB: loop body
LE: loop exit
PB: predicated region body
PF: predicated region fallthrough
CT: control target
= control target key end

     0   :  { %7 = vsyncpa [#allocation3], 0  ;;  %s279_s0 = inlined_call_operand.hbm [shape: f32[16,32], index: 0, kind: input, shape index: {}]   ;;  %s280_s1 = inlined_call_operand.hbm [shape: f32[32,96], index: 1, kind: input, shape index: {}]   ;;  %s281_s2 = inlined_call_operand.hbm [shape: f32[16,96], index: 2, kind: output, shape index: {}]  }
   0x1   :  { %8 = vsyncpa [#allocation6], 0 }
   0x2   :  { %9 = vsyncpa [#allocation4], 0  ;;  %s239_s9 = smov [#allocation2]  }
   0x3   :  { %s15_s10 = sshll.u32 %s239_s9, 4  ;;  %s16_s10 = int_to_ptr.vmem [resolvable:$true] %s15_s10 }
   0x4   :  { %s181_s11 = scalar_lea.vmem %s16_s10, 256  ;;  %p186_p1 = scmp.lt.s32.totalorder %s16_s10, %s16_s10 }
   0x5   :  { %p182_p0 = scmp.ne.s32.totalorder %s16_s10, %s181_s11  ;;  %p187_p2 = scmp.lt.s32.totalorder %s181_s11, %s181_s11 }
   0x7   :  { %p188_p3 = por %p187_p2, %p186_p1 }
   0x9   :  { %p189_p4 = pnand %p188_p3, %p182_p0 }
   0xb   :  { %192 = shalt.err (!%p189_p4)
}
   0xc   :  { %s240_s12 = smov 128   ;;  %s241_s13 = smov 8  }
   0xd   :  { %21 = dma.hbm_to_vmem [thread:$0]  %s279_s0, 256, %s16_s10, [#allocation3], %s240_s12, %s240_s12, %s241_s13  }
   0xe   :  { %s242_s16 = smov [#allocation5]  }
   0xf   :  { %s27_s17 = sshll.u32 %s242_s16, 4  ;;  %s28_s17 = int_to_ptr.vmem [resolvable:$true] %s27_s17 }
  0x10   :  { %s201_s18 = scalar_lea.vmem %s28_s17, 512  ;;  %p206_p6 = scmp.lt.s32.totalorder %s28_s17, %s28_s17 }
  0x11   :  { %p202_p5 = scmp.ne.s32.totalorder %s28_s17, %s201_s18  ;;  %p207_p7 = scmp.lt.s32.totalorder %s201_s18, %s201_s18 }
  0x13   :  { %p208_p8 = por %p207_p7, %p206_p6 }
  0x15   :  { %p209_p9 = pnand %p208_p8, %p202_p5 }
  0x17   :  { %212 = shalt.err (!%p209_p9)
}
  0x18   :  { %33 = dma.hbm_to_vmem [thread:$0]  %s280_s1, 512, %s28_s17, [#allocation6], %s240_s12, %s240_s12, %s241_s13  }
  0x19   :  { %233 = dma.done.wait [#allocation3], 256  }
  0x1a   :  { %234 = vsyncadd [#allocation3], 4294967040 }
  0x1b   :  { %235 = dma.done.wait [#allocation6], 512  }
  0x1c   :  { %236 = vsyncadd [#allocation6], 4294966784  ;;  %vm46_vm0 = vcmask 261120   ;;  %v45_v0 = vld [vmem:[#allocation5 + $0x18] sm:$0xff]  ;;  %v44_v1 = vld [vmem:[#allocation5 + $0x10] sm:$0xff]  ;;  %vm128_vm1 = vcmask 785408  }
  0x1d   :  { %157 = vmatprep.subr.mxu0 %v45_v0  ;;  %v40_v2 = vld [vmem:[#allocation2] sm:$0xff]  ;;  %v43_v3 = vld [vmem:[#allocation5 + $0x8] sm:$0xff]  ;;  %v42_v4 = vld [vmem:[#allocation5] sm:$0xff]  ;;  %s243_s0 = smov [#allocation7]  }
  0x1e   :  { %158 = vmatpush3.msra.mxu0 %v45_v0  ;;  %165 = vmatprep.mubr.msk.f32.mxu0 %vm46_vm0, %v40_v2  ;;  %v41_v5 = vld [vmem:[#allocation2 + $0x8] sm:$0xff]  ;;  %s136_s1 = sshll.u32 %s243_s0, 4  ;;  %s137_s1 = int_to_ptr.vmem [resolvable:$true] %s136_s1 }
  0x1f   :  { %159 = vmatprep.subr.mxu0 %v44_v1  ;;  %s213_s21 = scalar_lea.vmem %s137_s1, 256  ;;  %p218_p11 = scmp.lt.s32.totalorder %s137_s1, %s137_s1 }
  0x20   :  { %160 = vmatpush3.msra.mxu0 %v44_v1  ;;  %p214_p10 = scmp.ne.s32.totalorder %s137_s1, %s213_s21  ;;  %p219_p12 = scmp.lt.s32.totalorder %s213_s21, %s213_s21 }
  0x21   :  { %161 = vmatprep.subr.mxu0 %v43_v3 }
  0x22   :  { %162 = vmatpush3.msra.mxu0 %v43_v3  ;;  %p220_p13 = por %p219_p12, %p218_p11 }
  0x23   :  { %163 = vmatprep.subr.mxu0 %v42_v4 }
  0x24   :  { %164 = vmatpush3.msra.mxu0 %v42_v4  ;;  %p221_p0 = pnand %p220_p13, %p214_p10 }
  0x25   :  { %166 = vmatmul.mubr.msk.f32.vlgmr.msra.gmra.mxu0 %vm46_vm0, %v41_v5 }
  0xe5   :  { %v167_v6 = vpop.f32.mrf.mxu0 }
  0xe6   :  { %130 = vst.msk [vmem:[#allocation7 + $0x8] sm:$0xff] %vm128_vm1, %v167_v6 }
  0xe7   :  { %v119_v7 = vpop.f32.mrf.mxu0 }
  0xe8   :  { %129 = vst.msk [vmem:[#allocation7] sm:$0xff] %vm128_vm1, %v119_v7 }
  0xe9   :  { %224 = shalt.err (!%p221_p0)
}
  0xea   :  { %142 = dma.vmem_to_hbm [thread:$0]  %s137_s1, 256, %s281_s2, [#allocation4], %s240_s12, %s240_s12, %s241_s13  }
  0xeb   :  { %237 = dma.done.wait [#allocation4], 256  }
  0xec   :  { %238 = vsyncadd [#allocation4], 4294967040 }
  0xed   :  { %146 = vsyncpa [#allocation3], 1 }
  0xee   :  { %147 = vsyncpa [#allocation6], 1 }
  0xef   :  { %148 = vsyncpa [#allocation4], 1 }

</bundles_post_ra>
